<compile_context>
chip_gen: v7x
topology: tpu7x:2x2x1
jax: 0.10.0
libtpu: 0.0.40
codegen_flags: <defaults>
</compile_context>

<pallas_src>
import jax
import jax.numpy as jnp
from jax import lax
from jax.experimental import pallas as pl
from jax.experimental.pallas import tpu as pltpu


def _qvalue_kernel(x_ref, a_ref, w1x_ref, w1a_ref, b1_ref, w2_ref, b2_ref,
                   w3t_ref, b3_ref, out_ref):
    """Fused 3-layer MLP on one batch tile of TB rows."""
    # fc1 on the split inputs (fuses torch.cat): relu(x@W1x + a@W1a + b1).
    h1 = jnp.dot(x_ref[...], w1x_ref[...], preferred_element_type=jnp.float32)
    h1 = h1 + jnp.dot(a_ref[...], w1a_ref[...],
                      preferred_element_type=jnp.float32)
    h1 = jnp.maximum(h1 + b1_ref[...], 0.0)

    # fc2: relu(h1@W2 + b2).
    h2 = jnp.dot(h1, w2_ref[...], preferred_element_type=jnp.float32)
    h2 = jnp.maximum(h2 + b2_ref[...], 0.0)

    # fc_out as an NT matmul: (1, H) . (TB, H)^T -> lane-dense (1, TB) slab.
    q = lax.dot_general(w3t_ref[...], h2,
                        dimension_numbers=(((1,), (1,)), ((), ())),
                        preferred_element_type=jnp.float32)
    out_ref[...] = (q + b3_ref[...]).astype(out_ref.dtype)


def qvalue_net_forward(x, a, params, *, block_b=512):
    """x: (B, state_dim), a: (B, action_dim) -> (B, 1)."""
    w1x, w1a, b1, w2, b2, w3t, b3 = params
    B, state_dim = x.shape
    action_dim = a.shape[1]
    hidden = w2.shape[0]

    # Batch tile: big tiles amortize the ~0.35us per-grid-step overhead; for
    # batches smaller than one tile, round up to a sublane (8) multiple so a
    # single grid step covers everything.
    tb = block_b if B >= block_b else max(8, ((B + 7) // 8) * 8)
    num_tiles = pl.cdiv(B, tb)
    b_pad = num_tiles * tb
    if b_pad != B:  # zero-pad the tail tile; padded rows are dropped below.
        x = jnp.pad(x, ((0, b_pad - B), (0, 0)))
        a = jnp.pad(a, ((0, b_pad - B), (0, 0)))

    flops = int(2 * b_pad
                * ((state_dim + action_dim) * hidden + hidden * hidden + hidden))
    bytes_accessed = int(
        x.size * x.dtype.itemsize + a.size * a.dtype.itemsize
        + sum(int(p.size) * p.dtype.itemsize
              for p in (w1x, w1a, b1, w2, b2, w3t, b3))
        + b_pad * 4)

    def const(shape):  # full-array block, resident across all grid steps
        return pl.BlockSpec(shape, lambda i: (0,) * len(shape))

    out = pl.pallas_call(
        _qvalue_kernel,
        out_shape=jax.ShapeDtypeStruct((1, b_pad), jnp.float32),
        grid=(num_tiles,),
        in_specs=[
            pl.BlockSpec((tb, state_dim), lambda i: (i, 0)),
            pl.BlockSpec((tb, action_dim), lambda i: (i, 0)),
            const(w1x.shape), const(w1a.shape), const(b1.shape),
            const(w2.shape), const(b2.shape),
            const(w3t.shape), const(b3.shape),
        ],
        out_specs=pl.BlockSpec((1, tb), lambda i: (0, i)),
        compiler_params=pltpu.CompilerParams(
            dimension_semantics=("parallel",),
            vmem_limit_bytes=32 * 1024 * 1024,
        ),
        cost_estimate=pl.CostEstimate(
            flops=flops, transcendentals=0, bytes_accessed=bytes_accessed),
    )(x, a, w1x, w1a, b1, w2, b2, w3t, b3)

    # Lane-dense (1, b_pad) slab -> (B, 1) column expected by the caller.
    return out[0, :B].reshape(B, 1)


def init_params(key, state_dim, hidden_dim, action_dim):
    """PyTorch nn.Linear-style init (U(-1/sqrt(fan_in), +1/sqrt(fan_in))).

    Layout for the kernel:
      * fc1 weight pre-split into (state_dim, H) / (action_dim, H) blocks,
      * fc2 weight (H, H),
      * fc_out weight stored as a (1, H) row (for the NT final matmul),
      * biases shaped (1, out_features) / (1, 1), all f32.
    """
    def linear(key, fan_in, fan_out):
        kw, kb = jax.random.split(key)
        bound = 1.0 / (fan_in ** 0.5)
        w = jax.random.uniform(kw, (fan_in, fan_out), jnp.float32, -bound, bound)
        b = jax.random.uniform(kb, (1, fan_out), jnp.float32, -bound, bound)
        return w, b

    k1, k2, k3 = jax.random.split(key, 3)
    in_dim = state_dim + action_dim
    w1, b1 = linear(k1, in_dim, hidden_dim)
    w2, b2 = linear(k2, hidden_dim, hidden_dim)
    w3, b3 = linear(k3, hidden_dim, 1)

    return (w1[:state_dim], w1[state_dim:], b1, w2, b2, w3.T, b3)


def reference_forward(x, a, params):
    """Pure-JAX reference matching the PyTorch forward (full f32 math)."""
    w1x, w1a, b1, w2, b2, w3t, b3 = params
    cat = jnp.concatenate([x, a], axis=1)
    w1 = jnp.concatenate([w1x, w1a], axis=0)
    hp = jax.lax.Precision.HIGHEST
    h1 = jnp.maximum(jnp.dot(cat, w1, precision=hp) + b1, 0.0)
    h2 = jnp.maximum(jnp.dot(h1, w2, precision=hp) + b2, 0.0)
    return jnp.dot(h2, w3t.T, precision=hp) + b3


if __name__ == "__main__":
    state_dim, hidden_dim, action_dim = 8, 32, 4

    key = jax.random.PRNGKey(0)
    kx, ka, kp, kx2, ka2 = jax.random.split(key, 5)
    params = init_params(kp, state_dim, hidden_dim, action_dim)

    # Small demo batch (single-tile path).
    batch = 2
    x = jax.random.normal(kx, (batch, state_dim), jnp.float32)
    a = jax.random.normal(ka, (batch, action_dim), jnp.float32)
    out = qvalue_net_forward(x, a, params)
    jax.block_until_ready(out)
    ref = reference_forward(x, a, params)
    assert out.shape == (batch, 1)
    assert jnp.allclose(out, ref, atol=2e-3), "mismatch vs reference (small batch)"

    # Non-tile-aligned larger batch exercises the grid + tail-padding path.
    batch2 = 777
    x2 = jax.random.normal(kx2, (batch2, state_dim), jnp.float32)
    a2 = jax.random.normal(ka2, (batch2, action_dim), jnp.float32)
    out2 = qvalue_net_forward(x2, a2, params)
    jax.block_until_ready(out2)
    ref2 = reference_forward(x2, a2, params)
    assert out2.shape == (batch2, 1)
    assert jnp.allclose(out2, ref2, atol=2e-3), "mismatch vs reference (tiled batch)"

    print("KERNEL_OK")
</pallas_src>

<mosaic_0001>
module attributes {stable_mosaic.version = 11 : i64} {
  func.func @_qvalue_kernel(%arg0: i32, %arg1: memref<8x8xf32, #tpu.memory_space<vmem>>, %arg2: memref<8x4xf32, #tpu.memory_space<vmem>>, %arg3: memref<8x32xf32, #tpu.memory_space<vmem>>, %arg4: memref<4x32xf32, #tpu.memory_space<vmem>>, %arg5: memref<1x32xf32, #tpu.memory_space<vmem>>, %arg6: memref<32x32xf32, #tpu.memory_space<vmem>>, %arg7: memref<1x32xf32, #tpu.memory_space<vmem>>, %arg8: memref<1x32xf32, #tpu.memory_space<vmem>>, %arg9: memref<1x1xf32, #tpu.memory_space<vmem>>, %arg10: memref<1x8xf32, #tpu.memory_space<vmem>>) attributes {dimension_semantics = [#tpu.dimension_semantics<parallel>], iteration_bounds = array<i64: 1>, scalar_prefetch = 0 : i64, scratch_operands = 0 : i64, tpu.core_type = #tpu.core_type<tc>, window_params = [{transform_indices = @transform_0, window_bounds = array<i64: 8, 8>}, {transform_indices = @transform_1, window_bounds = array<i64: 8, 4>}, {pipeline_mode = #tpu.pipeline_mode<synchronous>, transform_indices = @transform_2, window_bounds = array<i64: 8, 32>}, {pipeline_mode = #tpu.pipeline_mode<synchronous>, transform_indices = @transform_3, window_bounds = array<i64: 4, 32>}, {pipeline_mode = #tpu.pipeline_mode<synchronous>, transform_indices = @transform_4, window_bounds = array<i64: 1, 32>}, {pipeline_mode = #tpu.pipeline_mode<synchronous>, transform_indices = @transform_5, window_bounds = array<i64: 32, 32>}, {pipeline_mode = #tpu.pipeline_mode<synchronous>, transform_indices = @transform_6, window_bounds = array<i64: 1, 32>}, {pipeline_mode = #tpu.pipeline_mode<synchronous>, transform_indices = @transform_7, window_bounds = array<i64: 1, 32>}, {pipeline_mode = #tpu.pipeline_mode<synchronous>, transform_indices = @transform_8, window_bounds = array<i64: 1, 1>}, {transform_indices = @transform_9, window_bounds = array<i64: 1, 8>}]} {
    %c0 = arith.constant 0 : index
    %c0_0 = arith.constant 0 : index
    %0 = vector.load %arg1[%c0, %c0_0] : memref<8x8xf32, #tpu.memory_space<vmem>>, vector<8x8xf32>
    %c0_1 = arith.constant 0 : index
    %c0_2 = arith.constant 0 : index
    %1 = vector.load %arg3[%c0_1, %c0_2] : memref<8x32xf32, #tpu.memory_space<vmem>>, vector<8x32xf32>
    %cst = arith.constant dense<0.000000e+00> : vector<8x32xf32>
    %2 = tpu.matmul %0, %1, %cst {dimension_numbers = #tpu.dot_dimension_numbers<[1], [0], [0], [1], [0, 0, 1, 1], [], []>} : vector<8x8xf32>, vector<8x32xf32>, vector<8x32xf32> -> vector<8x32xf32>
    %c0_3 = arith.constant 0 : index
    %c0_4 = arith.constant 0 : index
    %3 = vector.load %arg2[%c0_3, %c0_4] : memref<8x4xf32, #tpu.memory_space<vmem>>, vector<8x4xf32>
    %c0_5 = arith.constant 0 : index
    %c0_6 = arith.constant 0 : index
    %4 = vector.load %arg4[%c0_5, %c0_6] : memref<4x32xf32, #tpu.memory_space<vmem>>, vector<4x32xf32>
    %cst_7 = arith.constant dense<0.000000e+00> : vector<8x32xf32>
    %5 = tpu.matmul %3, %4, %cst_7 {dimension_numbers = #tpu.dot_dimension_numbers<[1], [0], [0], [1], [0, 0, 1, 1], [], []>} : vector<8x4xf32>, vector<4x32xf32>, vector<8x32xf32> -> vector<8x32xf32>
    %6 = arith.addf %2, %5 : vector<8x32xf32>
    %c0_8 = arith.constant 0 : index
    %c0_9 = arith.constant 0 : index
    %7 = vector.load %arg5[%c0_8, %c0_9] : memref<1x32xf32, #tpu.memory_space<vmem>>, vector<1x32xf32>
    %8 = vector.broadcast %7 : vector<1x32xf32> to vector<8x32xf32>
    %9 = arith.addf %6, %8 : vector<8x32xf32>
    %cst_10 = arith.constant 0.000000e+00 : f32
    %10 = vector.broadcast %cst_10 : f32 to vector<8x32xf32>
    %11 = arith.maximumf %9, %10 : vector<8x32xf32>
    %c0_11 = arith.constant 0 : index
    %c0_12 = arith.constant 0 : index
    %12 = vector.load %arg6[%c0_11, %c0_12] : memref<32x32xf32, #tpu.memory_space<vmem>>, vector<32x32xf32>
    %cst_13 = arith.constant dense<0.000000e+00> : vector<8x32xf32>
    %13 = tpu.matmul %11, %12, %cst_13 {dimension_numbers = #tpu.dot_dimension_numbers<[1], [0], [0], [1], [0, 0, 1, 1], [], []>} : vector<8x32xf32>, vector<32x32xf32>, vector<8x32xf32> -> vector<8x32xf32>
    %c0_14 = arith.constant 0 : index
    %c0_15 = arith.constant 0 : index
    %14 = vector.load %arg7[%c0_14, %c0_15] : memref<1x32xf32, #tpu.memory_space<vmem>>, vector<1x32xf32>
    %15 = vector.broadcast %14 : vector<1x32xf32> to vector<8x32xf32>
    %16 = arith.addf %13, %15 : vector<8x32xf32>
    %cst_16 = arith.constant 0.000000e+00 : f32
    %17 = vector.broadcast %cst_16 : f32 to vector<8x32xf32>
    %18 = arith.maximumf %16, %17 : vector<8x32xf32>
    %c0_17 = arith.constant 0 : index
    %c0_18 = arith.constant 0 : index
    %19 = vector.load %arg8[%c0_17, %c0_18] : memref<1x32xf32, #tpu.memory_space<vmem>>, vector<1x32xf32>
    %cst_19 = arith.constant dense<0.000000e+00> : vector<1x8xf32>
    %20 = tpu.matmul %19, %18, %cst_19 {dimension_numbers = #tpu.dot_dimension_numbers<[1], [1], [0], [0], [0, 0, 1, 0], [], []>} : vector<1x32xf32>, vector<8x32xf32>, vector<1x8xf32> -> vector<1x8xf32>
    %c0_20 = arith.constant 0 : index
    %c0_21 = arith.constant 0 : index
    %21 = vector.load %arg9[%c0_20, %c0_21] : memref<1x1xf32, #tpu.memory_space<vmem>>, vector<1x1xf32>
    %22 = vector.broadcast %21 : vector<1x1xf32> to vector<1x8xf32>
    %23 = arith.addf %20, %22 : vector<1x8xf32>
    %c0_22 = arith.constant 0 : index
    %c0_23 = arith.constant 0 : index
    %24 = vector.load %arg10[%c0_22, %c0_23] : memref<1x8xf32, #tpu.memory_space<vmem>>, vector<1x8xf32>
    tpu.vector_store %arg10[%c0_22, %c0_23], %23 {strides = array<i32>} : memref<1x8xf32, #tpu.memory_space<vmem>>, vector<1x8xf32>,
    return
  }
  func.func @transform_0(%arg0: i32) -> (i32, i32) {
    %c0_i32 = arith.constant 0 : i32
    %c0_i32_0 = arith.constant 0 : i32
    return %arg0, %c0_i32 : i32, i32
  }
  func.func @transform_1(%arg0: i32) -> (i32, i32) {
    %c0_i32 = arith.constant 0 : i32
    %c0_i32_0 = arith.constant 0 : i32
    return %arg0, %c0_i32 : i32, i32
  }
  func.func @transform_2(%arg0: i32) -> (i32, i32) {
    %c0_i32 = arith.constant 0 : i32
    %c0_i32_0 = arith.constant 0 : i32
    %c0_i32_1 = arith.constant 0 : i32
    return %c0_i32, %c0_i32_0 : i32, i32
  }
  func.func @transform_3(%arg0: i32) -> (i32, i32) {
    %c0_i32 = arith.constant 0 : i32
    %c0_i32_0 = arith.constant 0 : i32
    %c0_i32_1 = arith.constant 0 : i32
    return %c0_i32, %c0_i32_0 : i32, i32
  }
  func.func @transform_4(%arg0: i32) -> (i32, i32) {
    %c0_i32 = arith.constant 0 : i32
    %c0_i32_0 = arith.constant 0 : i32
    %c0_i32_1 = arith.constant 0 : i32
    return %c0_i32, %c0_i32_0 : i32, i32
  }
  func.func @transform_5(%arg0: i32) -> (i32, i32) {
    %c0_i32 = arith.constant 0 : i32
    %c0_i32_0 = arith.constant 0 : i32
    %c0_i32_1 = arith.constant 0 : i32
    return %c0_i32, %c0_i32_0 : i32, i32
  }
  func.func @transform_6(%arg0: i32) -> (i32, i32) {
    %c0_i32 = arith.constant 0 : i32
    %c0_i32_0 = arith.constant 0 : i32
    %c0_i32_1 = arith.constant 0 : i32
    return %c0_i32, %c0_i32_0 : i32, i32
  }
  func.func @transform_7(%arg0: i32) -> (i32, i32) {
    %c0_i32 = arith.constant 0 : i32
    %c0_i32_0 = arith.constant 0 : i32
    %c0_i32_1 = arith.constant 0 : i32
    return %c0_i32, %c0_i32_0 : i32, i32
  }
  func.func @transform_8(%arg0: i32) -> (i32, i32) {
    %c0_i32 = arith.constant 0 : i32
    %c0_i32_0 = arith.constant 0 : i32
    %c0_i32_1 = arith.constant 0 : i32
    return %c0_i32, %c0_i32_0 : i32, i32
  }
  func.func @transform_9(%arg0: i32) -> (i32, i32) {
    %c0_i32 = arith.constant 0 : i32
    %c0_i32_0 = arith.constant 0 : i32
    return %c0_i32, %arg0 : i32, i32
  }
}

</mosaic_0001>

<bundles_post_ra>
// kernel: tpu_custom_call.1
= control target key start
LH: loop header
LB: loop body
LE: loop exit
PB: predicated region body
PF: predicated region fallthrough
CT: control target
= control target key end

     0   :  { %s717_s0 = inlined_call_operand.hbm [shape: f32[8,8], index: 0, kind: input, shape index: {}]   ;;  %s718_s1 = inlined_call_operand.vmem [shape: f32[8,4], index: 1, kind: input, shape index: {}]   ;;  %s719_s2 = inlined_call_operand.hbm [shape: f32[8,32], index: 2, kind: input, shape index: {}]   ;;  %s720_s3 = inlined_call_operand.hbm [shape: f32[4,32], index: 3, kind: input, shape index: {}]   ;;  %s721_s4 = inlined_call_operand.vmem [shape: f32[1,32], index: 4, kind: input, shape index: {}]   ;;  %s722_s5 = inlined_call_operand.vmem [shape: f32[32,32], index: 5, kind: input, shape index: {}]   ;;  %s723_s6 = inlined_call_operand.vmem [shape: f32[1,32], index: 6, kind: input, shape index: {}]   ;;  %s724_s7 = inlined_call_operand.vmem [shape: f32[1,32], index: 7, kind: input, shape index: {}]   ;;  %s725_s8 = inlined_call_operand.<no memory space> [shape: f32[1,1], index: 8, kind: input, shape index: {}]   ;;  %s726_s9 = inlined_call_operand.hbm [shape: f32[1,8], index: 9, kind: output, shape index: {}]  }
   0x1   :  { %v14_v0 = vstv %s725_s8 }
   0x2   :  { %15 = vst [vmem:[#allocation2] sm:$0x1] %v14_v0 }
   0x3   :  { %16 = vsyncpa [#allocation4], 0 }
   0x4   :  { %17 = vsyncpa [#allocation7], 0 }
   0x5   :  { %18 = vsyncpa [#allocation5], 0  ;;  %s580_s11 = smov [#allocation6]   ;;  %s581_s13 = smov [#allocation3]  }
   0x6   :  { %s37_s12 = sshll.u32 %s580_s11, 4  ;;  %s25_s14 = sshll.u32 %s581_s13, 4  ;;  %s38_s12 = int_to_ptr.vmem [resolvable:$true] %s37_s12  ;;  %s26_s14 = int_to_ptr.vmem [resolvable:$true] %s25_s14 }
   0x7   :  { %s486_s17 = scalar_lea.hbm %s719_s2, 128 }
   0x8   :  { %p487_p0 = scmp.ne.s32.totalorder %s719_s2, %s486_s17  ;;  %p490_p1 = scmp.lt.u32.totalorder %s486_s17, %s719_s2 }
   0xa   :  { %p492_p2 = pnand %p490_p1, %p487_p0 }
   0xc   :  { %495 = shalt.err (!%p492_p2)
}
   0xd   :  { %s496_s21 = scalar_lea.vmem %s38_s12, 128  ;;  %p501_p4 = scmp.lt.s32.totalorder %s38_s12, %s38_s12 }
   0xe   :  { %p497_p3 = scmp.ne.s32.totalorder %s38_s12, %s496_s21  ;;  %p502_p5 = scmp.lt.s32.totalorder %s496_s21, %s496_s21 }
  0x10   :  { %p503_p6 = por %p502_p5, %p501_p4 }
  0x12   :  { %p504_p7 = pnand %p503_p6, %p497_p3 }
  0x14   :  { %507 = shalt.err (!%p504_p7)
}
  0x15   :  { %40 = dma.hbm_to_vmem [thread:$0]  %s719_s2, 128, %s38_s12, [#allocation7]  }
  0x16   :  { %s508_s26 = scalar_lea.hbm %s717_s0, 128 }
  0x17   :  { %p509_p8 = scmp.ne.s32.totalorder %s717_s0, %s508_s26  ;;  %p512_p9 = scmp.lt.u32.totalorder %s508_s26, %s717_s0 }
  0x19   :  { %p514_p10 = pnand %p512_p9, %p509_p8 }
  0x1b   :  { %517 = shalt.err (!%p514_p10)
}
  0x1c   :  { %s518_s10 = scalar_lea.vmem %s26_s14, 128  ;;  %p523_p12 = scmp.lt.s32.totalorder %s26_s14, %s26_s14 }
  0x1d   :  { %p519_p11 = scmp.ne.s32.totalorder %s26_s14, %s518_s10  ;;  %p524_p13 = scmp.lt.s32.totalorder %s518_s10, %s518_s10 }
  0x1f   :  { %p525_p0 = por %p524_p13, %p523_p12 }
  0x21   :  { %p526_p1 = pnand %p525_p0, %p519_p11 }
  0x23   :  { %529 = shalt.err (!%p526_p1)
}
  0x24   :  { %28 = dma.hbm_to_vmem [thread:$0]  %s717_s0, 128, %s26_s14, [#allocation4]  }
  0x25   :  { %s582_s12 = smov [#allocation8]   ;;  %s530_s17 = scalar_lea.hbm %s720_s3, 64 }
  0x26   :  { %s47_s13 = sshll.u32 %s582_s12, 4  ;;  %p531_p2 = scmp.ne.s32.totalorder %s720_s3, %s530_s17  ;;  %s48_s13 = int_to_ptr.vmem [resolvable:$true] %s47_s13 }
  0x27   :  { %p534_p3 = scmp.lt.u32.totalorder %s530_s17, %s720_s3 }
  0x29   :  { %p536_p4 = pnand %p534_p3, %p531_p2 }
  0x2b   :  { %539 = shalt.err (!%p536_p4)
}
  0x2c   :  { %s540_s21 = scalar_lea.vmem %s48_s13, 64  ;;  %p545_p6 = scmp.lt.s32.totalorder %s48_s13, %s48_s13 }
  0x2d   :  { %p541_p5 = scmp.ne.s32.totalorder %s48_s13, %s540_s21  ;;  %p546_p7 = scmp.lt.s32.totalorder %s540_s21, %s540_s21 }
  0x2f   :  { %p547_p8 = por %p546_p7, %p545_p6 }
  0x31   :  { %p548_p9 = pnand %p547_p8, %p541_p5 }
  0x33   :  { %551 = shalt.err (!%p548_p9)
}
  0x34   :  { %50 = dma.hbm_to_vmem [thread:$0]  %s720_s3, 64, %s48_s13, [#allocation7]  }
  0x35   :  { %574 = dma.done.wait [#allocation4], 128  }
  0x36   :  { %575 = vsyncadd [#allocation4], 4294967168 }
  0x37   :  { %576 = dma.done.wait [#allocation7], 192  }
  0x38   :  { %577 = vsyncadd [#allocation7], 4294967104  ;;  %v583_v1 = vmov 0.0   ;;  %vm584_vm0 = vmmov 0   ;;  %vm78_vm1 = vcmask 1043456   ;;  %vm74_vm2 = vcmask 31744  }
  0x39   :  { %445 = vmatprep.subr.mxu0 %v583_v1  ;;  %450 = vmatprep.subr.mxu1 %v583_v1  ;;  %vm152_vm3 = vcmask 64512   ;;  %v73_v2 = vld [vmem:[#allocation8] sm:$0xf]  ;;  %v71_v3 = vld [vmem:[#allocation6] sm:$0xff]  ;;  %v72_v4 = vld [vmem:[%s718_s1] sm:$0xff]  ;;  %v585_v6 = vmov 0.0|0.0   ;;  %v328_v29 = vlaneseq }
  0x3a   :  { %447 = vmatprep.mubr.msk.f32.mxu0 %vm584_vm0, %v583_v1  ;;  %452 = vmatprep.mubr.msk.f32.mxu1 %vm584_vm0, %v583_v1  ;;  %v70_v5 = vld [vmem:[#allocation3] sm:$0xff]  ;;  %v237_v10 = vld [vmem:[%s722_s5 + $0x10] sm:$0xff]  ;;  %v238_v11 = vld [vmem:[%s722_s5 + $0x18] sm:$0xff]  ;;  %vm246_vm4 = vcmask 261120   ;;  %v586_v22 = vmov 0   ;;  %s587_s12 = smov [#allocation9]  }
  0x3b   :  { %446 = vmatpush3.msk.msra.mxu0 %vm78_vm1, %v73_v2  ;;  %451 = vmatpush3.msra.mxu1 %v71_v3  ;;  %v235_v7 = vld [vmem:[%s722_s5] sm:$0xff]  ;;  %v236_v8 = vld [vmem:[%s722_s5 + $0x8] sm:$0xff]  ;;  %v475_v12 = vpack.c.bf16 %v238_v11, %v237_v10  ;;  %v329_v30 = vshrl.u32 %v328_v29, 7  ;;  %s416_s13 = sshll.u32 %s587_s12, 4  ;;  %vm408_vm5 = vcmask 57344   ;;  %s417_s13 = int_to_ptr.vmem [resolvable:$true] %s416_s13 }
  0x3c   :  { %448 = vmatmul.mubr.msk.f32.vlgmr.msra.gmra.mrb[0].mxu0 %vm74_vm2, %v72_v4  ;;  %453 = vmatmul.mubr.msk.f32.vlgmr.msra.gmra.mrb[0].mxu1 %vm152_vm3, %v70_v5  ;;  %v472_v9 = vpack.c.bf16 %v236_v8, %v235_v7  ;;  %v429_v15 = vld [vmem:[%s721_s4] ss:$0 sm:$0xff]  ;;  %s556_s15 = scalar_lea.vmem %s417_s13, 32  ;;  %p557_p11 = scmp.lt.s32.totalorder %s417_s13, %s417_s13 }
  0x3d   :  { %471 = vmatprep.subr.bf16.mxu0 %v585_v6  ;;  %463 = vmatprep.mubr.msk.f32.mxu0 %vm584_vm0, %v583_v1  ;;  %v322_v21 = vld [vmem:[#allocation2] sm:$0x1]  ;;  %v330_v31 = vsub.s32 0, %v329_v30 }
  0x3e   :  { %466 = vmatprep.subr.mxu1 %v583_v1  ;;  %468 = vmatprep.mubr.msk.f32.mxu1 %vm584_vm0, %v583_v1  ;;  %v430_v23 = vld [vmem:[%s723_s6] ss:$0 sm:$0xff]  ;;  %s552_s6 = scalar_lea.vmem %s417_s13, 16 }
  0x3f   :  { %473 = vmatpush3.bf16.msra.mxu0 %v472_v9  ;;  %485 = vset.pattern.permute.xlu0 %v586_v22  ;;  %v321_v28 = vld [vmem:[%s724_s7] sm:$0x1]  ;;  %p553_p10 = scmp.ne.s32.totalorder %s417_s13, %s552_s6  ;;  %p558_p12 = scmp.lt.s32.totalorder %s556_s15, %s552_s6 }
  0x40   :  { %474 = vmatprep.subr.bf16.mxu0 %v585_v6  ;;  %325 = vperm.xlu0 %485, %v322_v21  }
  0x41   :  { %p559_p13 = por %p558_p12, %p557_p11 }
  0x43   :  { %476 = vmatpush3.bf16.msra.mxu0 %v475_v12  ;;  %p560_p0 = pnand %p559_p13, %p553_p10 }
  0xbf   :  { %v326_v32 = vpop.permute.xlu0 %325 }
  0xc0   :  { %v331_v33 = vrot.slane %v326_v32, %v330_v31 }
 0x10f   :  { %v148_v13 = vpop.f32.mrb[0].mxu0  ;;  %v222_v14 = vpop.f32.mrb[0].mxu1 }
 0x110   :  { %v223_v16 = vadd.f32 %v222_v14, %v148_v13  ;;  %v449_v17 = vpop.f32.mrb[1].mxu0  ;;  %v454_v18 = vpop.f32.mrb[1].mxu1 }
 0x112   :  { %v233_v19 = vadd.f32 %v429_v15, %v223_v16 }
 0x114   :  { %v234_v20 = vmax.f32 %v233_v19, 0.0 }
 0x116   :  { %464 = vmatmul.mubr.msk.f32.vlgmr.msra.gmra.mrb[2].mxu0 %vm246_vm4, %v234_v20 }
 0x1e9   :  { %v316_v24 = vpop.f32.mrb[2].mxu0 }
 0x1ea   :  { %v317_v25 = vadd.f32 %v430_v23, %v316_v24  ;;  %v465_v26 = vpop.f32.mrb[3].mxu0 }
 0x1ec   :  { %v320_v27 = vmax.f32 %v317_v25, 0.0 }
 0x1ee   :  { %467 = vmatpush3.xpose.msk.msra.mxu1 %vm246_vm4, %v320_v27 }
 0x1f1   :  { %469 = vmatmul.mubr.msk.f32.vlgmr.msra.gmra.mrb[2].mxu1 %vm246_vm4, %v321_v28 }
 0x2c4   :  { %v404_v34 = vpop.f32.mrb[2].mxu1 }
 0x2c5   :  { %v405_v35 = vadd.f32 %v404_v34, %v331_v33  ;;  %v470_v36 = vpop.f32.mrb[3].mxu1 }
 0x2c7   :  { %409 = vst.msk [vmem:[#allocation9] sm:$0x1] %vm408_vm5, %v405_v35 }
 0x2c8   :  { %563 = shalt.err (!%p560_p0)
}
 0x2c9   :  { %s564_s17 = scalar_lea.hbm %s726_s9, 16 }
 0x2ca   :  { %p565_p1 = scmp.ne.s32.totalorder %s726_s9, %s564_s17  ;;  %p568_p2 = scmp.lt.u32.totalorder %s564_s17, %s726_s9 }
 0x2cc   :  { %p570_p3 = pnand %p568_p2, %p565_p1 }
 0x2ce   :  { %573 = shalt.err (!%p570_p3)
}
 0x2cf   :  { %419 = dma.vmem_to_hbm [thread:$0]  %s417_s13, 16, %s726_s9, [#allocation5]  }
 0x2d0   :  { %578 = dma.done.wait [#allocation5], 16  }
 0x2d1   :  { %579 = vsyncadd [#allocation5], 4294967280 }
 0x2d2   :  { %423 = vsyncpa [#allocation4], 1 }
 0x2d3   :  { %424 = vsyncpa [#allocation7], 1 }
 0x2d4   :  { %425 = vsyncpa [#allocation5], 1 }

</bundles_post_ra>
